<compile_context>
chip_gen: v7x
topology: tpu7x:2x2x1
jax: 0.10.0
libtpu: 0.0.40
codegen_flags: <defaults>
</compile_context>

<pallas_src>
import functools
import numpy as np
import jax
import jax.numpy as jnp
from jax.experimental import pallas as pl
from jax.experimental.pallas import tpu as pltpu

EMBED_DIM = 256
NUM_CLASSES = 7
OUT_HW = 7            # AdaptiveAvgPool2d output spatial size
OUT_PAD = 8           # classifier columns padded 7 -> 8 (masked 8-lane store, small HBM writes)
MAX_TILE_B = 1024     # upper cap on batch tile rows (diminishing returns above this)


def _round_up(x, m):
    return ((x + m - 1) // m) * m


@functools.lru_cache(maxsize=None)
def adaptive_pool_matrix_np(H, W, oh=OUT_HW, ow=OUT_HW):
    """Exact AdaptiveAvgPool2d((oh, ow)) as a (H*W, oh*ow) matrix: x_flat @ P == pooled_flat."""
    P = np.zeros((H * W, oh * ow), dtype=np.float32)
    for i in range(oh):
        hs = (i * H) // oh
        he = -((-(i + 1) * H) // oh)          # ceil((i+1)*H/oh)
        for j in range(ow):
            ws = (j * W) // ow
            we = -((-(j + 1) * W) // ow)
            area = float((he - hs) * (we - ws))
            for h in range(hs, he):
                for w in range(ws, we):
                    P[h * W + w, i * ow + j] = 1.0 / area
    return P


def _vmem_budget_bytes():
    """~80% of per-core VMEM (leaves compiler scratch headroom); conservative fallback."""
    cap = 64 * 2 ** 20
    try:
        info = pltpu.get_tpu_info()
        cap = int(getattr(info, "vmem_capacity_bytes", cap))
    except Exception:
        pass
    return int(0.8 * cap)


def mlp_kernel(x_ref, w1_ref, b1_ref, w2_ref, b2_ref, o_ref):
    # (pool-fused) Linear -> ReLU -> Linear, bf16 operands on the MXU, f32 accumulation.
    x = x_ref[...].astype(jnp.bfloat16)                                   # (TILE_B, K)
    h = jnp.dot(x, w1_ref[...], preferred_element_type=jnp.float32) + b1_ref[...]
    h = jnp.maximum(h, 0.0)                                               # (TILE_B, EMBED_DIM)
    out = jnp.dot(h.astype(jnp.bfloat16), w2_ref[...],
                  preferred_element_type=jnp.float32) + b2_ref[...]       # (TILE_B, OUT_PAD)
    o_ref[...] = out.astype(o_ref.dtype)


@jax.jit
def test_model_forward(x, params):
    """x: (B, 1, H, W) float32, NCHW like PyTorch.  Returns (B, NUM_CLASSES) float32."""
    B, C, H, W = x.shape
    assert C == 1, "Linear(49, ...) after Flatten implies a single input channel."
    HW = H * W
    w1, b1, w2, b2 = params

    budget = _vmem_budget_bytes()
    P = jnp.asarray(adaptive_pool_matrix_np(H, W))                        # (HW, 49)

    # --- choose formulation (trace time, static shapes) -------------------------------
    # Fold the pooling matrix into W1 only when the fused (HW, EMBED_DIM) bf16 weight
    # (double-buffered by the pipeline) comfortably fits VMEM; otherwise pre-pool with
    # XLA so the kernel's K dim is 49 and the resident weight stays tiny.
    fused_w_bytes = 2 * HW * EMBED_DIM * 2                                 # 2 buffers, bf16
    if fused_w_bytes <= budget // 4:
        x_in = x.reshape(B, HW).astype(jnp.float32)
        w1_in = (P @ w1).astype(jnp.bfloat16)                              # (HW, EMBED_DIM)
        K = HW
    else:
        # TODO(synk): for very large H*W, tile the K axis inside the kernel instead of
        # pre-pooling in XLA (keeps everything in one kernel).
        x_in = x.reshape(B, HW).astype(jnp.float32) @ P                    # (B, 49)
        w1_in = w1.astype(jnp.bfloat16)                                    # (49, EMBED_DIM)
        K = OUT_HW * OUT_HW

    b1_in = b1.reshape(1, EMBED_DIM).astype(jnp.float32)
    w2_pad = jnp.zeros((EMBED_DIM, OUT_PAD), jnp.bfloat16).at[:, :NUM_CLASSES].set(
        w2.astype(jnp.bfloat16))
    b2_pad = jnp.zeros((1, OUT_PAD), jnp.float32).at[:, :NUM_CLASSES].set(
        b2.reshape(1, NUM_CLASSES))

    # --- batch tiling (no batch padding, no extra HBM pass over x) --------------------
    #  * tiny batches: one exact-size block (block dim == full array dim is always legal)
    #  * otherwise: tile_b multiple of 16 (bf16 sublane packing), large enough to
    #    amortize per-step overhead, small enough to fit VMEM and to give >= 2 grid
    #    steps (v7x megacore).  Last block may be partial: its writes are masked and its
    #    out-of-range input rows never influence in-range output rows (row-wise matmul).
    w1_bytes = 2 * K * EMBED_DIM * 2
    if B <= 16:
        tile_b = B
    else:
        per_row = 2 * 4 * (K + OUT_PAD)                    # double-buffered f32 x + out rows
        vmem_rows = max((budget // 2 - w1_bytes) // per_row, 16)
        tile_b = min(MAX_TILE_B, vmem_rows, _round_up(pl.cdiv(B, 2), 16))
        tile_b = max(16, (tile_b // 16) * 16)
    grid = (pl.cdiv(B, tile_b),)

    # --- VMEM limit & cost estimate ----------------------------------------------------
    need = (2 * tile_b * K * 4                 # x blocks (double-buffered, f32)
            + 2 * tile_b * OUT_PAD * 4         # out blocks
            + w1_bytes                         # w1 (bf16, 2 buffers)
            + 2 * EMBED_DIM * 4                # b1
            + 2 * EMBED_DIM * OUT_PAD * 2      # w2 (bf16)
            + 2 * OUT_PAD * 4                  # b2
            + tile_b * (K * 2 + EMBED_DIM * 6 + OUT_PAD * 4))   # in-kernel temporaries
    vmem_limit = int(min(max(int(1.5 * need), 16 * 2 ** 20), budget))

    flops = 2 * B * (K * EMBED_DIM + EMBED_DIM * OUT_PAD)
    bytes_accessed = (4 * B * (K + OUT_PAD)
                      + 2 * (K * EMBED_DIM + EMBED_DIM * OUT_PAD)
                      + 4 * (EMBED_DIM + OUT_PAD))

    out_pad = pl.pallas_call(
        mlp_kernel,
        out_shape=jax.ShapeDtypeStruct((B, OUT_PAD), jnp.float32),
        grid_spec=pltpu.PrefetchScalarGridSpec(
            num_scalar_prefetch=0,
            grid=grid,
            in_specs=[
                pl.BlockSpec((tile_b, K), lambda i: (i, 0)),              # x tile
                pl.BlockSpec((K, EMBED_DIM), lambda i: (0, 0)),           # W1 (VMEM-resident)
                pl.BlockSpec((1, EMBED_DIM), lambda i: (0, 0)),           # b1 (resident)
                pl.BlockSpec((EMBED_DIM, OUT_PAD), lambda i: (0, 0)),     # padded W2 (resident)
                pl.BlockSpec((1, OUT_PAD), lambda i: (0, 0)),             # padded b2 (resident)
            ],
            out_specs=pl.BlockSpec((tile_b, OUT_PAD), lambda i: (i, 0)),
        ),
        compiler_params=pltpu.CompilerParams(
            dimension_semantics=("parallel",),
            vmem_limit_bytes=vmem_limit,
        ),
        cost_estimate=pl.CostEstimate(
            flops=flops, transcendentals=0, bytes_accessed=bytes_accessed),
    )(x_in, w1_in, b1_in, w2_pad, b2_pad)

    return out_pad[:, :NUM_CLASSES]


def init_params(key):
    """Deterministic PyTorch-style uniform(-1/sqrt(fan_in), 1/sqrt(fan_in)) init."""
    k1, k2, k3, k4 = jax.random.split(key, 4)
    lim1 = 1.0 / np.sqrt(49.0)
    lim2 = 1.0 / np.sqrt(float(EMBED_DIM))
    w1 = jax.random.uniform(k1, (49, EMBED_DIM), jnp.float32, -lim1, lim1)
    b1 = jax.random.uniform(k2, (1, EMBED_DIM), jnp.float32, -lim1, lim1)
    w2 = jax.random.uniform(k3, (EMBED_DIM, NUM_CLASSES), jnp.float32, -lim2, lim2)
    b2 = jax.random.uniform(k4, (1, NUM_CLASSES), jnp.float32, -lim2, lim2)
    return w1, b1, w2, b2


def reference_forward(x, params):
    """Pure-JAX f32 reference (same op order as the PyTorch module: pool -> flatten -> mlp)."""
    B, C, H, W = x.shape
    x_flat = x.reshape(B, H * W).astype(jnp.float32)
    P = jnp.asarray(adaptive_pool_matrix_np(H, W))
    w1, b1, w2, b2 = params
    pooled = x_flat @ P
    h = jnp.maximum(pooled @ w1 + b1, 0.0)
    return h @ w2 + b2


if __name__ == "__main__":
    key = jax.random.PRNGKey(0)
    kx, kp = jax.random.split(key)

    # Small NCHW input; H=W=14 so each adaptive-pool region is 2x2 (exact for any H, W).
    x = jax.random.normal(kx, (2, 1, 14, 14), dtype=jnp.float32)
    params = init_params(kp)

    out = test_model_forward(x, params)
    out = jax.block_until_ready(out)

    ref = reference_forward(x, params)
    assert out.shape == (2, NUM_CLASSES)
    # bf16 MXU operands (f32 accumulation) + P-into-W1 fusion change summation order /
    # operand precision slightly -> deliberately relaxed tolerance.
    np.testing.assert_allclose(np.asarray(out), np.asarray(ref), rtol=2e-2, atol=1e-2)

    print("KERNEL_OK")
</pallas_src>

<mosaic_0001>
module attributes {stable_mosaic.version = 11 : i64} {
  func.func @mlp_kernel(%arg0: i32, %arg1: memref<2x196xf32, #tpu.memory_space<vmem>>, %arg2: memref<196x256xbf16, #tpu.memory_space<vmem>>, %arg3: memref<1x256xf32, #tpu.memory_space<vmem>>, %arg4: memref<256x8xbf16, #tpu.memory_space<vmem>>, %arg5: memref<1x8xf32, #tpu.memory_space<vmem>>, %arg6: memref<2x8xf32, #tpu.memory_space<vmem>>) attributes {dimension_semantics = [#tpu.dimension_semantics<parallel>], iteration_bounds = array<i64: 1>, scalar_prefetch = 0 : i64, scratch_operands = 0 : i64, tpu.core_type = #tpu.core_type<tc>, window_params = [{transform_indices = @transform_0, window_bounds = array<i64: 2, 196>}, {pipeline_mode = #tpu.pipeline_mode<synchronous>, transform_indices = @transform_1, window_bounds = array<i64: 196, 256>}, {pipeline_mode = #tpu.pipeline_mode<synchronous>, transform_indices = @transform_2, window_bounds = array<i64: 1, 256>}, {pipeline_mode = #tpu.pipeline_mode<synchronous>, transform_indices = @transform_3, window_bounds = array<i64: 256, 8>}, {pipeline_mode = #tpu.pipeline_mode<synchronous>, transform_indices = @transform_4, window_bounds = array<i64: 1, 8>}, {transform_indices = @transform_5, window_bounds = array<i64: 2, 8>}]} {
    %c0 = arith.constant 0 : index
    %c0_0 = arith.constant 0 : index
    %0 = vector.load %arg1[%c0, %c0_0] : memref<2x196xf32, #tpu.memory_space<vmem>>, vector<2x196xf32>
    %1 = arith.truncf %0 : vector<2x196xf32> to vector<2x196xbf16>
    %c0_1 = arith.constant 0 : index
    %c0_2 = arith.constant 0 : index
    %2 = vector.load %arg2[%c0_1, %c0_2] : memref<196x256xbf16, #tpu.memory_space<vmem>>, vector<196x256xbf16>
    %cst = arith.constant dense<0.000000e+00> : vector<2x256xf32>
    %3 = tpu.matmul %1, %2, %cst {dimension_numbers = #tpu.dot_dimension_numbers<[1], [0], [0], [1], [0, 0, 1, 1], [], []>} : vector<2x196xbf16>, vector<196x256xbf16>, vector<2x256xf32> -> vector<2x256xf32>
    %c0_3 = arith.constant 0 : index
    %c0_4 = arith.constant 0 : index
    %4 = vector.load %arg3[%c0_3, %c0_4] : memref<1x256xf32, #tpu.memory_space<vmem>>, vector<1x256xf32>
    %5 = vector.broadcast %4 : vector<1x256xf32> to vector<2x256xf32>
    %6 = arith.addf %3, %5 : vector<2x256xf32>
    %cst_5 = arith.constant 0.000000e+00 : f32
    %7 = vector.broadcast %cst_5 : f32 to vector<2x256xf32>
    %8 = arith.maximumf %6, %7 : vector<2x256xf32>
    %9 = arith.truncf %8 : vector<2x256xf32> to vector<2x256xbf16>
    %c0_6 = arith.constant 0 : index
    %c0_7 = arith.constant 0 : index
    %10 = vector.load %arg4[%c0_6, %c0_7] : memref<256x8xbf16, #tpu.memory_space<vmem>>, vector<256x8xbf16>
    %cst_8 = arith.constant dense<0.000000e+00> : vector<2x8xf32>
    %11 = tpu.matmul %9, %10, %cst_8 {dimension_numbers = #tpu.dot_dimension_numbers<[1], [0], [0], [1], [0, 0, 1, 1], [], []>} : vector<2x256xbf16>, vector<256x8xbf16>, vector<2x8xf32> -> vector<2x8xf32>
    %c0_9 = arith.constant 0 : index
    %c0_10 = arith.constant 0 : index
    %12 = vector.load %arg5[%c0_9, %c0_10] : memref<1x8xf32, #tpu.memory_space<vmem>>, vector<1x8xf32>
    %13 = vector.broadcast %12 : vector<1x8xf32> to vector<2x8xf32>
    %14 = arith.addf %11, %13 : vector<2x8xf32>
    %c0_11 = arith.constant 0 : index
    %c0_12 = arith.constant 0 : index
    %15 = vector.load %arg6[%c0_11, %c0_12] : memref<2x8xf32, #tpu.memory_space<vmem>>, vector<2x8xf32>
    tpu.vector_store %arg6[%c0_11, %c0_12], %14 {strides = array<i32>} : memref<2x8xf32, #tpu.memory_space<vmem>>, vector<2x8xf32>,
    return
  }
  func.func @transform_0(%arg0: i32) -> (i32, i32) {
    %c0_i32 = arith.constant 0 : i32
    %c0_i32_0 = arith.constant 0 : i32
    return %arg0, %c0_i32 : i32, i32
  }
  func.func @transform_1(%arg0: i32) -> (i32, i32) {
    %c0_i32 = arith.constant 0 : i32
    %c0_i32_0 = arith.constant 0 : i32
    %c0_i32_1 = arith.constant 0 : i32
    return %c0_i32, %c0_i32_0 : i32, i32
  }
  func.func @transform_2(%arg0: i32) -> (i32, i32) {
    %c0_i32 = arith.constant 0 : i32
    %c0_i32_0 = arith.constant 0 : i32
    %c0_i32_1 = arith.constant 0 : i32
    return %c0_i32, %c0_i32_0 : i32, i32
  }
  func.func @transform_3(%arg0: i32) -> (i32, i32) {
    %c0_i32 = arith.constant 0 : i32
    %c0_i32_0 = arith.constant 0 : i32
    %c0_i32_1 = arith.constant 0 : i32
    return %c0_i32, %c0_i32_0 : i32, i32
  }
  func.func @transform_4(%arg0: i32) -> (i32, i32) {
    %c0_i32 = arith.constant 0 : i32
    %c0_i32_0 = arith.constant 0 : i32
    %c0_i32_1 = arith.constant 0 : i32
    return %c0_i32, %c0_i32_0 : i32, i32
  }
  func.func @transform_5(%arg0: i32) -> (i32, i32) {
    %c0_i32 = arith.constant 0 : i32
    %c0_i32_0 = arith.constant 0 : i32
    return %arg0, %c0_i32 : i32, i32
  }
}

</mosaic_0001>

<bundles_post_ra>
// kernel: test_model_forward.1
= control target key start
LH: loop header
LB: loop body
LE: loop exit
PB: predicated region body
PF: predicated region fallthrough
CT: control target
= control target key end

     0   :  { %vm198_vm0 = vcmask 556032   ;;  %s773_s0 = inlined_call_operand.vmem [shape: f32[2,196], index: 0, kind: input, shape index: {}]   ;;  %s774_s1 = inlined_call_operand.vmem [shape: bf16[196,256], index: 1, kind: input, shape index: {}]   ;;  %s775_s2 = inlined_call_operand.vmem [shape: f32[1,256], index: 2, kind: input, shape index: {}]   ;;  %s776_s3 = inlined_call_operand.vmem [shape: bf16[256,8], index: 3, kind: input, shape index: {}]   ;;  %s777_s4 = inlined_call_operand.vmem [shape: f32[1,8], index: 4, kind: input, shape index: {}]   ;;  %s778_s5 = inlined_call_operand.hbm [shape: f32[2,8], index: 5, kind: output, shape index: {}]  }
   0x1   :  { %v514_v0 = vld [vmem:[%s774_s1 + $0x4] ss:$8 sps:$4 sm:$0xff]   ;;  %v516_v1 = vld [vmem:[%s774_s1] ss:$8 sps:$4 sm:$0xff]   ;;  %v517_v2 = vld [vmem:[%s774_s1 + $0x14] ss:$8 sps:$4 sm:$0xff]  }
   0x2   :  { %209 = vmatprep.subr.bf16.mxu0 %v514_v0  ;;  %v519_v3 = vld [vmem:[%s774_s1 + $0x10] ss:$8 sps:$4 sm:$0xff]   ;;  %v520_v4 = vld [vmem:[%s774_s1 + $0x24] ss:$8 sps:$4 sm:$0xff]   ;;  %v522_v5 = vld [vmem:[%s774_s1 + $0x20] ss:$8 sps:$4 sm:$0xff]  }
   0x3   :  { %210 = vmatpush1.bf16.msra.mxu0 %v516_v1  ;;  %v523_v6 = vld [vmem:[%s774_s1 + $0x34] ss:$8 sps:$4 sm:$0xff]   ;;  %v525_v7 = vld [vmem:[%s774_s1 + $0x30] ss:$8 sps:$4 sm:$0xff]   ;;  %v526_v8 = vld [vmem:[%s774_s1 + $0x44] ss:$8 sps:$4 sm:$0xff]  }
   0x4   :  { %211 = vmatprep.subr.bf16.mxu0 %v517_v2  ;;  %v528_v9 = vld [vmem:[%s774_s1 + $0x40] ss:$8 sps:$4 sm:$0xff]   ;;  %v529_v10 = vld [vmem:[%s774_s1 + $0x54] ss:$8 sps:$4 sm:$0xff]   ;;  %v531_v12 = vld [vmem:[%s774_s1 + $0x50] ss:$8 sps:$4 sm:$0xff]  }
   0x5   :  { %v659_v11 = vld.sshfl [vmem:[%s773_s0] sm:$0x33 pattern:$0x76325410]  ;;  %v532_v15 = vld [vmem:[%s774_s1 + $0x64] ss:$8 sps:$4 sm:$0xff]  }
   0x6   :  { %v31_v13 = vcombine.high %v659_v11, %v659_v11  ;;  %v552_v14 = vld [vmem:[%s776_s3 + $0x40] sm:$0xff]   ;;  %v554_v18 = vld [vmem:[%s776_s3 + $0x48] sm:$0xff]   ;;  %v556_v20 = vld [vmem:[%s776_s3 + $0x50] sm:$0xff]  }
   0x7   :  { %212 = vmatpush1.bf16.msra.mxu0 %v519_v3  ;;  %v553_v16 = vld [vmem:[%s776_s3] sm:$0xff]   ;;  %491 = vmatprep.subr.bf16.mxu1 %v552_v14  ;;  %v555_v19 = vld [vmem:[%s776_s3 + $0x8] sm:$0xff]   ;;  %v535_v22 = vld [vmem:[%s774_s1 + $0x74] ss:$8 sps:$4 sm:$0xff]  }
   0x8   :  { %213 = vmatprep.subr.bf16.mxu0 %v520_v4  ;;  %v35_v17 = vpack.c.bf16 %v31_v13, %v31_v13  ;;  %492 = vmatpush3.bf16.msra.mxu1 %v553_v16  ;;  %v534_v21 = vld [vmem:[%s774_s1 + $0x60] ss:$8 sps:$4 sm:$0xff]   ;;  %v557_v23 = vld [vmem:[%s776_s3 + $0x10] sm:$0xff]   ;;  %v558_v24 = vld [vmem:[%s776_s3 + $0x58] sm:$0xff]  }
   0x9   :  { %493 = vmatprep.subr.bf16.mxu1 %v554_v18  ;;  %v537_v25 = vld [vmem:[%s774_s1 + $0x70] ss:$8 sps:$4 sm:$0xff]   ;;  %v538_v26 = vld [vmem:[%s774_s1 + $0x84] ss:$8 sps:$4 sm:$0xff]   ;;  %v540_v28 = vld [vmem:[%s774_s1 + $0x80] ss:$8 sps:$4 sm:$0xff]  }
   0xa   :  { %473 = vmatprep.mubr.msk.bf16.mxu0 %vm198_vm0, %v35_v17  ;;  %v559_v27 = vld [vmem:[%s776_s3 + $0x18] sm:$0xff]   ;;  %v560_v29 = vld [vmem:[%s776_s3 + $0x60] sm:$0xff]  }
   0xb   :  { %214 = vmatpush1.bf16.msra.mxu0 %v522_v5  ;;  %v541_v30 = vld [vmem:[%s774_s1 + $0x94] ss:$8 sps:$4 sm:$0xff]   ;;  %v561_v31 = vld [vmem:[%s776_s3 + $0x20] sm:$0xff]  }
   0xc   :  { %215 = vmatprep.subr.bf16.mxu0 %v523_v6  ;;  %494 = vmatpush3.bf16.msra.mxu1 %v555_v19 }
   0xd   :  { %495 = vmatprep.subr.bf16.mxu1 %v556_v20 }
   0xf   :  { %216 = vmatpush1.bf16.msra.mxu0 %v525_v7 }
  0x10   :  { %217 = vmatprep.subr.bf16.mxu0 %v526_v8  ;;  %496 = vmatpush3.bf16.msra.mxu1 %v557_v23 }
  0x11   :  { %497 = vmatprep.subr.bf16.mxu1 %v558_v24 }
  0x13   :  { %218 = vmatpush1.bf16.msra.mxu0 %v528_v9 }
  0x14   :  { %219 = vmatprep.subr.bf16.mxu0 %v529_v10  ;;  %498 = vmatpush3.bf16.msra.mxu1 %v559_v27 }
  0x17   :  { %220 = vmatpush1.bf16.msra.mxu0 %v531_v12 }
  0x18   :  { %221 = vmatprep.subr.bf16.mxu0 %v532_v15 }
  0x1b   :  { %222 = vmatpush1.bf16.msra.mxu0 %v534_v21 }
  0x1c   :  { %223 = vmatprep.subr.bf16.mxu0 %v535_v22 }
  0x1f   :  { %224 = vmatpush1.bf16.msra.mxu0 %v537_v25 }
  0x20   :  { %225 = vmatprep.subr.bf16.mxu0 %v538_v26 }
  0x21   :  { %10 = vsyncpa [#allocation3], 0  ;;  %499 = vmatprep.subr.bf16.mxu1 %v560_v29  ;;  %v562_v32 = vld [vmem:[%s776_s3 + $0x68] sm:$0xff]   ;;  %v543_v33 = vld [vmem:[%s774_s1 + $0x90] ss:$8 sps:$4 sm:$0xff]   ;;  %vm202_vm1 = vcmask 1041408   ;;  %v34_v43 = vpack.c.bf16 %v659_v11, %v659_v11  ;;  %v63_v48 = vlaneseq }
  0x22   :  { %v544_v34 = vld [vmem:[%s774_s1 + $0xa4] ss:$8 sps:$4 sm:$0xff]   ;;  %500 = vmatpush3.bf16.msra.mxu1 %v561_v31  ;;  %v546_v36 = vld [vmem:[%s774_s1 + $0xa0] ss:$8 sps:$4 sm:$0xff]   ;;  %v547_v37 = vld [vmem:[%s774_s1 + $0xb4] ss:$8 sps:$4 sm:$0xff]  }
  0x23   :  { %226 = vmatpush1.bf16.msra.mxu0 %v540_v28  ;;  %v563_v35 = vld [vmem:[%s776_s3 + $0x28] sm:$0xff]   ;;  %501 = vmatprep.subr.bf16.mxu1 %v562_v32  ;;  %v60_v38 = vld [vmem:[%s774_s1 + $0xc0] sm:$0x33]  ;;  %v549_v39 = vld [vmem:[%s774_s1 + $0xb0] ss:$8 sps:$4 sm:$0xff]   ;;  %v64_v49 = vshrl.u32 %v63_v48, 7 }
  0x24   :  { %227 = vmatprep.subr.bf16.mxu0 %v541_v30  ;;  %v471_v40 = vcombine.high %v60_v38, %v60_v38  ;;  %v470_v41 = vcombine.low %v60_v38, %v60_v38  ;;  %v564_v44 = vld [vmem:[%s776_s3 + $0x70] sm:$0xff]   ;;  %v566_v46 = vld [vmem:[%s776_s3 + $0x78] sm:$0xff]   ;;  %v61_v51 = vld [vmem:[%s775_s2] sm:$0x3]  ;;  %s592_s2 = smov [#allocation2]   ;;  %vm429_vm2 = vcmask 58368  }
  0x25   :  { %v565_v45 = vld [vmem:[%s776_s3 + $0x30] sm:$0xff]   ;;  %v567_v47 = vld [vmem:[%s776_s3 + $0x38] sm:$0xff]   ;;  %v65_v50 = vsub.s32 0, %v64_v49  ;;  %v69_v52 = vsub.s32 1, %v64_v49  ;;  %v474_v2 = vld [vmem:[%s777_s4] ss:$0 sm:$0xff] }
  0x26   :  { %502 = vmatpush3.bf16.msra.mxu1 %v563_v35  ;;  %v204_v42 = vsel %vm202_vm1, %v470_v41, 0  ;;  %s437_s26 = sshll.u32 %s592_s2, 4  ;;  %s438_s26 = int_to_ptr.vmem [resolvable:$true] %s437_s26 }
  0x27   :  { %228 = vmatpush1.bf16.msra.mxu0 %v543_v33  ;;  %503 = vmatprep.subr.bf16.mxu1 %v564_v44  ;;  %v66_v53 = vrot.slane %v61_v51, %v65_v50  ;;  %v70_v54 = vrot.slane %v61_v51, %v69_v52  ;;  %s568_s27 = scalar_lea.vmem %s438_s26, 32  ;;  %p573_p1 = scmp.lt.s32.totalorder %s438_s26, %s438_s26 }
  0x28   :  { %229 = vmatprep.subr.bf16.mxu0 %v544_v34  ;;  %p569_p0 = scmp.ne.s32.totalorder %s438_s26, %s568_s27  ;;  %p574_p2 = scmp.lt.s32.totalorder %s568_s27, %s568_s27 }
  0x2a   :  { %504 = vmatpush3.bf16.msra.mxu1 %v565_v45  ;;  %p575_p3 = por %p574_p2, %p573_p1 }
  0x2b   :  { %230 = vmatpush1.bf16.msra.mxu0 %v546_v36  ;;  %505 = vmatprep.subr.bf16.mxu1 %v566_v46 }
  0x2c   :  { %231 = vmatprep.subr.bf16.mxu0 %v547_v37  ;;  %p576_p4 = pnand %p575_p3, %p569_p0 }
  0x2e   :  { %506 = vmatpush3.bf16.msra.mxu1 %v567_v47 }
  0x2f   :  { %232 = vmatpush1.bf16.msra.mxu0 %v549_v39 }
  0x30   :  { %472 = vmatprep.subr.msk.bf16.mxu0 %vm202_vm1, %v471_v40 }
  0x33   :  { %234 = vmatpush1.bf16.msra.mxu0 %v204_v42 }
  0x36   :  { %242 = vmatmul.mubr.bf16.vlgmr.msra.gmra.mrb[0].mxu0 %v34_v43 }
 0x109   :  { %v243_v55 = vpop.f32.mrb[0].mxu0 }
 0x10a   :  { %v244_v56 = vadd.f32 %v243_v55, %v66_v53  ;;  %v245_v57 = vpop.f32.mrb[1].mxu0 }
 0x10b   :  { %v246_v58 = vadd.f32 %v245_v57, %v70_v54  ;;  %v247_v59 = vpop.f32.mrb[2].mxu0 }
 0x10c   :  { %v250_v60 = vmax.f32 %v244_v56, 0.0  ;;  %v248_v61 = vpop.f32.mrb[3].mxu0 }
 0x10d   :  { %v251_v62 = vmax.f32 %v246_v58, 0.0 }
 0x10e   :  { %v252_v0 = vpack.c.bf16 %v250_v60, %v250_v60 }
 0x10f   :  { %v253_v63 = vpack.c.bf16 %v251_v62, %v251_v62 }
 0x111   :  { %421 = vmatprep.mubr.bf16.mxu1 %v253_v63 }
 0x112   :  { %422 = vmatmul.mubr.bf16.vlgmr.msra.gmra.mrb[0].mxu1 %v252_v0 }
 0x1e5   :  { %v507_v1 = vpop.f32.mrb[0].mxu1 }
 0x1e6   :  { %v508_v3 = vpop.f32.mrb[1].mxu1 }
 0x1e7   :  { %v509_v4 = vadd.f32 %v508_v3, %v507_v1  ;;  %v510_v5 = vpop.f32.mrb[2].mxu1 }
 0x1e8   :  { %v511_v6 = vpop.f32.mrb[3].mxu1 }
 0x1e9   :  { %v424_v7 = vadd.f32 %v509_v4, %v474_v2 }
 0x1eb   :  { %430 = vst.msk [vmem:[#allocation2] sm:$0x3] %vm429_vm2, %v424_v7 }
 0x1ec   :  { %579 = shalt.err (!%p576_p4)
}
 0x1ed   :  { %s580_s4 = scalar_lea.hbm %s778_s5, 32 }
 0x1ee   :  { %p581_p5 = scmp.ne.s32.totalorder %s778_s5, %s580_s4  ;;  %p584_p6 = scmp.lt.u32.totalorder %s580_s4, %s778_s5 }
 0x1f0   :  { %p586_p7 = pnand %p584_p6, %p581_p5 }
 0x1f2   :  { %589 = shalt.err (!%p586_p7)
}
 0x1f3   :  { %440 = dma.vmem_to_hbm [thread:$0]  %s438_s26, 32, %s778_s5, [#allocation3]  }
 0x1f4   :  { %590 = dma.done.wait [#allocation3], 32  }
 0x1f5   :  { %591 = vsyncadd [#allocation3], 4294967264 }
 0x1f6   :  { %444 = vsyncpa [#allocation3], 1 }

</bundles_post_ra>
